<compile_context>
chip_gen: v7x
topology: tpu7x:2x2x1
jax: 0.10.0
libtpu: 0.0.40
codegen_flags: <defaults>
</compile_context>

<pallas_src>
import functools

import jax
import jax.numpy as jnp
from jax.experimental import pallas as pl
from jax.experimental.pallas import tpu as pltpu


def _conv_ds_kernel(xpf_ref, w_ref, b_ref, o_ref, *, kh, kw, c_out, h_out, w_out):
    """One batch image per grid step.

    xpf_ref: (kw, 2, 1, C_in, (H_out+1)*W_out)  stride-2 phase-split input (flat spatial)
    w_ref  : (kh*kw, C_out, C_in)               per-tap 1x1 weights (resident)
    b_ref  : (C_out, 1)
    o_ref  : (1, C_out, H_out*W_out)            lane-dense flattened output
    """
    hw = h_out * w_out
    acc = jnp.zeros((c_out, hw), jnp.float32)
    # Unrolled reduction over the 3x3 taps; each tap is one small MXU dot
    # accumulated in f32 registers (reduction is fully inside one grid step,
    # so no scratch accumulator / pl.when init is needed).
    for dh in range(kh):
        for dw in range(kw):
            off = (dh // 2) * w_out                      # static row shift in flat space
            g = xpf_ref[dw, dh % 2, 0, :, off:off + hw]  # (C_in, HW)
            wk = w_ref[dh * kw + dw]                     # (C_out, C_in)
            acc = acc + jnp.dot(wk, g, preferred_element_type=jnp.float32)
    o_ref[0] = (acc + b_ref[...]).astype(o_ref.dtype)


def downsample_forward(x_nchw, weight, bias):
    """Conv2d(in_c, out_c, kernel_size=3, stride=2, padding=1), NCHW in/out."""
    N, C_in, H, W = x_nchw.shape
    C_out, _, kh, kw = weight.shape
    stride, padding = 2, 1
    assert kh == 3 and kw == 3, "DownSample uses a 3x3 kernel"
    assert H % 2 == 0 and W % 2 == 0, "even spatial dims expected"

    H_out = (H + 2 * padding - kh) // stride + 1
    W_out = (W + 2 * padding - kw) // stride + 1
    HW = H_out * W_out
    Hh = H_out + 1            # phase rows needed (covers the dh//2 in {0,1} shift)
    PHW = Hh * W_out

    # ---- glue: pad + stride-2 phase split (replaces 9x im2col + 2 transposes) ----
    x_pad = jnp.pad(x_nchw, ((0, 0), (0, 0), (padding, padding), (padding, padding)))
    phases = []
    for dw in range(kw):
        per_ph = []
        for ph in range(2):
            sl = x_pad[:, :,
                       ph:ph + 2 * (Hh - 1) + 1:2,
                       dw:dw + 2 * (W_out - 1) + 1:2]      # (N, C_in, Hh, W_out)
            per_ph.append(sl.reshape(N, C_in, PHW))
        phases.append(jnp.stack(per_ph, axis=0))
    xpf = jnp.stack(phases, axis=0)                        # (kw, 2, N, C_in, PHW)

    # weight (C_out, C_in, kh, kw) -> (kh*kw, C_out, C_in); bias -> (C_out, 1)
    w_r = jnp.transpose(weight, (2, 3, 0, 1)).reshape(kh * kw, C_out, C_in)
    b_r = bias.reshape(C_out, 1)

    kernel = functools.partial(_conv_ds_kernel, kh=kh, kw=kw, c_out=C_out,
                               h_out=H_out, w_out=W_out)

    itemsize = jnp.dtype(x_nchw.dtype).itemsize
    flops = 2 * N * HW * (kh * kw * C_in) * C_out
    bytes_accessed = (xpf.size + w_r.size + b_r.size + N * C_out * HW) * itemsize

    out_flat = pl.pallas_call(
        kernel,
        out_shape=jax.ShapeDtypeStruct((N, C_out, HW), x_nchw.dtype),
        grid=(N,),
        in_specs=[
            pl.BlockSpec((kw, 2, 1, C_in, PHW), lambda n: (0, 0, n, 0, 0)),
            pl.BlockSpec((kh * kw, C_out, C_in), lambda n: (0, 0, 0)),
            pl.BlockSpec((C_out, 1), lambda n: (0, 0)),
        ],
        out_specs=pl.BlockSpec((1, C_out, HW), lambda n: (n, 0, 0)),
        compiler_params=pltpu.CompilerParams(
            dimension_semantics=("parallel",),
            vmem_limit_bytes=32 * 1024 * 1024,
        ),
        cost_estimate=pl.CostEstimate(flops=flops, transcendentals=0,
                                      bytes_accessed=bytes_accessed),
    )(xpf, w_r, b_r)

    # free reshape: (N, C_out, H_out*W_out) -> (N, C_out, H_out, W_out)
    return out_flat.reshape(N, C_out, H_out, W_out)


if __name__ == "__main__":
    # Module config: DownSample(in_c=4, out_c=8, patch_size=3)
    N, C_in, H, W = 2, 4, 16, 16
    C_out, kh, kw = 8, 3, 3

    key = jax.random.PRNGKey(0)
    kx, kw_key, kb_key = jax.random.split(key, 3)

    x = jax.random.normal(kx, (N, C_in, H, W), dtype=jnp.float32)
    fan_in = C_in * kh * kw
    bound = 1.0 / (fan_in ** 0.5)
    weight = jax.random.uniform(kw_key, (C_out, C_in, kh, kw),
                                minval=-bound, maxval=bound, dtype=jnp.float32)
    bias = jax.random.uniform(kb_key, (C_out,),
                              minval=-bound, maxval=bound, dtype=jnp.float32)

    out = jax.jit(downsample_forward)(x, weight, bias)
    out = jax.block_until_ready(out)

    # correctness check vs lax conv (same semantics as torch conv2d)
    ref = jax.lax.conv_general_dilated(
        x, weight, window_strides=(2, 2), padding=((1, 1), (1, 1)),
        dimension_numbers=("NCHW", "OIHW", "NCHW"),
        precision=jax.lax.Precision.HIGHEST) + bias.reshape(1, C_out, 1, 1)
    assert out.shape == (N, C_out, 8, 8), out.shape
    err = float(jnp.max(jnp.abs(out - ref)))
    assert err < 1e-3, err

    print("KERNEL_OK")
</pallas_src>

<mosaic_0001>
module attributes {stable_mosaic.version = 11 : i64} {
  func.func @_conv_ds_kernel(%arg0: i32, %arg1: memref<3x2x1x4x72xf32, #tpu.memory_space<vmem>>, %arg2: memref<9x8x4xf32, #tpu.memory_space<vmem>>, %arg3: memref<8x1xf32, #tpu.memory_space<vmem>>, %arg4: memref<1x8x64xf32, #tpu.memory_space<vmem>>) attributes {dimension_semantics = [#tpu.dimension_semantics<parallel>], iteration_bounds = array<i64: 2>, scalar_prefetch = 0 : i64, scratch_operands = 0 : i64, tpu.core_type = #tpu.core_type<tc>, window_params = [{transform_indices = @transform_0, window_bounds = array<i64: 3, 2, 1, 4, 72>}, {pipeline_mode = #tpu.pipeline_mode<synchronous>, transform_indices = @transform_1, window_bounds = array<i64: 9, 8, 4>}, {pipeline_mode = #tpu.pipeline_mode<synchronous>, transform_indices = @transform_2, window_bounds = array<i64: 8, 1>}, {transform_indices = @transform_3, window_bounds = array<i64: 1, 8, 64>}]} {
    %cst = arith.constant 0.000000e+00 : f32
    %0 = vector.broadcast %cst : f32 to vector<8x64xf32>
    %c0 = arith.constant 0 : index
    %c0_0 = arith.constant 0 : index
    %c0_1 = arith.constant 0 : index
    %c0_2 = arith.constant 0 : index
    %c0_3 = arith.constant 0 : index
    %1 = vector.load %arg1[%c0, %c0_0, %c0_1, %c0_2, %c0_3] : memref<3x2x1x4x72xf32, #tpu.memory_space<vmem>>, vector<1x1x1x4x64xf32>
    %2 = vector.shape_cast %1 : vector<1x1x1x4x64xf32> to vector<4x64xf32>
    %c0_4 = arith.constant 0 : index
    %c0_5 = arith.constant 0 : index
    %c0_6 = arith.constant 0 : index
    %3 = vector.load %arg2[%c0_4, %c0_5, %c0_6] : memref<9x8x4xf32, #tpu.memory_space<vmem>>, vector<1x8x4xf32>
    %4 = vector.shape_cast %3 : vector<1x8x4xf32> to vector<8x4xf32>
    %cst_7 = arith.constant dense<0.000000e+00> : vector<8x64xf32>
    %5 = tpu.matmul %4, %2, %cst_7 {dimension_numbers = #tpu.dot_dimension_numbers<[1], [0], [0], [1], [0, 0, 1, 1], [], []>} : vector<8x4xf32>, vector<4x64xf32>, vector<8x64xf32> -> vector<8x64xf32>
    %6 = arith.addf %0, %5 : vector<8x64xf32>
    %c1 = arith.constant 1 : index
    %c0_8 = arith.constant 0 : index
    %c0_9 = arith.constant 0 : index
    %c0_10 = arith.constant 0 : index
    %c0_11 = arith.constant 0 : index
    %7 = vector.load %arg1[%c1, %c0_8, %c0_9, %c0_10, %c0_11] : memref<3x2x1x4x72xf32, #tpu.memory_space<vmem>>, vector<1x1x1x4x64xf32>
    %8 = vector.shape_cast %7 : vector<1x1x1x4x64xf32> to vector<4x64xf32>
    %c1_12 = arith.constant 1 : index
    %c0_13 = arith.constant 0 : index
    %c0_14 = arith.constant 0 : index
    %9 = vector.load %arg2[%c1_12, %c0_13, %c0_14] : memref<9x8x4xf32, #tpu.memory_space<vmem>>, vector<1x8x4xf32>
    %10 = vector.shape_cast %9 : vector<1x8x4xf32> to vector<8x4xf32>
    %cst_15 = arith.constant dense<0.000000e+00> : vector<8x64xf32>
    %11 = tpu.matmul %10, %8, %cst_15 {dimension_numbers = #tpu.dot_dimension_numbers<[1], [0], [0], [1], [0, 0, 1, 1], [], []>} : vector<8x4xf32>, vector<4x64xf32>, vector<8x64xf32> -> vector<8x64xf32>
    %12 = arith.addf %6, %11 : vector<8x64xf32>
    %c2 = arith.constant 2 : index
    %c0_16 = arith.constant 0 : index
    %c0_17 = arith.constant 0 : index
    %c0_18 = arith.constant 0 : index
    %c0_19 = arith.constant 0 : index
    %13 = vector.load %arg1[%c2, %c0_16, %c0_17, %c0_18, %c0_19] : memref<3x2x1x4x72xf32, #tpu.memory_space<vmem>>, vector<1x1x1x4x64xf32>
    %14 = vector.shape_cast %13 : vector<1x1x1x4x64xf32> to vector<4x64xf32>
    %c2_20 = arith.constant 2 : index
    %c0_21 = arith.constant 0 : index
    %c0_22 = arith.constant 0 : index
    %15 = vector.load %arg2[%c2_20, %c0_21, %c0_22] : memref<9x8x4xf32, #tpu.memory_space<vmem>>, vector<1x8x4xf32>
    %16 = vector.shape_cast %15 : vector<1x8x4xf32> to vector<8x4xf32>
    %cst_23 = arith.constant dense<0.000000e+00> : vector<8x64xf32>
    %17 = tpu.matmul %16, %14, %cst_23 {dimension_numbers = #tpu.dot_dimension_numbers<[1], [0], [0], [1], [0, 0, 1, 1], [], []>} : vector<8x4xf32>, vector<4x64xf32>, vector<8x64xf32> -> vector<8x64xf32>
    %18 = arith.addf %12, %17 : vector<8x64xf32>
    %c0_24 = arith.constant 0 : index
    %c1_25 = arith.constant 1 : index
    %c0_26 = arith.constant 0 : index
    %c0_27 = arith.constant 0 : index
    %c0_28 = arith.constant 0 : index
    %19 = vector.load %arg1[%c0_24, %c1_25, %c0_26, %c0_27, %c0_28] : memref<3x2x1x4x72xf32, #tpu.memory_space<vmem>>, vector<1x1x1x4x64xf32>
    %20 = vector.shape_cast %19 : vector<1x1x1x4x64xf32> to vector<4x64xf32>
    %c3 = arith.constant 3 : index
    %c0_29 = arith.constant 0 : index
    %c0_30 = arith.constant 0 : index
    %21 = vector.load %arg2[%c3, %c0_29, %c0_30] : memref<9x8x4xf32, #tpu.memory_space<vmem>>, vector<1x8x4xf32>
    %22 = vector.shape_cast %21 : vector<1x8x4xf32> to vector<8x4xf32>
    %cst_31 = arith.constant dense<0.000000e+00> : vector<8x64xf32>
    %23 = tpu.matmul %22, %20, %cst_31 {dimension_numbers = #tpu.dot_dimension_numbers<[1], [0], [0], [1], [0, 0, 1, 1], [], []>} : vector<8x4xf32>, vector<4x64xf32>, vector<8x64xf32> -> vector<8x64xf32>
    %24 = arith.addf %18, %23 : vector<8x64xf32>
    %c1_32 = arith.constant 1 : index
    %c1_33 = arith.constant 1 : index
    %c0_34 = arith.constant 0 : index
    %c0_35 = arith.constant 0 : index
    %c0_36 = arith.constant 0 : index
    %25 = vector.load %arg1[%c1_32, %c1_33, %c0_34, %c0_35, %c0_36] : memref<3x2x1x4x72xf32, #tpu.memory_space<vmem>>, vector<1x1x1x4x64xf32>
    %26 = vector.shape_cast %25 : vector<1x1x1x4x64xf32> to vector<4x64xf32>
    %c4 = arith.constant 4 : index
    %c0_37 = arith.constant 0 : index
    %c0_38 = arith.constant 0 : index
    %27 = vector.load %arg2[%c4, %c0_37, %c0_38] : memref<9x8x4xf32, #tpu.memory_space<vmem>>, vector<1x8x4xf32>
    %28 = vector.shape_cast %27 : vector<1x8x4xf32> to vector<8x4xf32>
    %cst_39 = arith.constant dense<0.000000e+00> : vector<8x64xf32>
    %29 = tpu.matmul %28, %26, %cst_39 {dimension_numbers = #tpu.dot_dimension_numbers<[1], [0], [0], [1], [0, 0, 1, 1], [], []>} : vector<8x4xf32>, vector<4x64xf32>, vector<8x64xf32> -> vector<8x64xf32>
    %30 = arith.addf %24, %29 : vector<8x64xf32>
    %c2_40 = arith.constant 2 : index
    %c1_41 = arith.constant 1 : index
    %c0_42 = arith.constant 0 : index
    %c0_43 = arith.constant 0 : index
    %c0_44 = arith.constant 0 : index
    %31 = vector.load %arg1[%c2_40, %c1_41, %c0_42, %c0_43, %c0_44] : memref<3x2x1x4x72xf32, #tpu.memory_space<vmem>>, vector<1x1x1x4x64xf32>
    %32 = vector.shape_cast %31 : vector<1x1x1x4x64xf32> to vector<4x64xf32>
    %c5 = arith.constant 5 : index
    %c0_45 = arith.constant 0 : index
    %c0_46 = arith.constant 0 : index
    %33 = vector.load %arg2[%c5, %c0_45, %c0_46] : memref<9x8x4xf32, #tpu.memory_space<vmem>>, vector<1x8x4xf32>
    %34 = vector.shape_cast %33 : vector<1x8x4xf32> to vector<8x4xf32>
    %cst_47 = arith.constant dense<0.000000e+00> : vector<8x64xf32>
    %35 = tpu.matmul %34, %32, %cst_47 {dimension_numbers = #tpu.dot_dimension_numbers<[1], [0], [0], [1], [0, 0, 1, 1], [], []>} : vector<8x4xf32>, vector<4x64xf32>, vector<8x64xf32> -> vector<8x64xf32>
    %36 = arith.addf %30, %35 : vector<8x64xf32>
    %c0_48 = arith.constant 0 : index
    %c0_49 = arith.constant 0 : index
    %c0_50 = arith.constant 0 : index
    %c0_51 = arith.constant 0 : index
    %c8 = arith.constant 8 : index
    %37 = vector.load %arg1[%c0_48, %c0_49, %c0_50, %c0_51, %c8] : memref<3x2x1x4x72xf32, #tpu.memory_space<vmem>>, vector<1x1x1x4x64xf32>
    %38 = vector.shape_cast %37 : vector<1x1x1x4x64xf32> to vector<4x64xf32>
    %c6 = arith.constant 6 : index
    %c0_52 = arith.constant 0 : index
    %c0_53 = arith.constant 0 : index
    %39 = vector.load %arg2[%c6, %c0_52, %c0_53] : memref<9x8x4xf32, #tpu.memory_space<vmem>>, vector<1x8x4xf32>
    %40 = vector.shape_cast %39 : vector<1x8x4xf32> to vector<8x4xf32>
    %cst_54 = arith.constant dense<0.000000e+00> : vector<8x64xf32>
    %41 = tpu.matmul %40, %38, %cst_54 {dimension_numbers = #tpu.dot_dimension_numbers<[1], [0], [0], [1], [0, 0, 1, 1], [], []>} : vector<8x4xf32>, vector<4x64xf32>, vector<8x64xf32> -> vector<8x64xf32>
    %42 = arith.addf %36, %41 : vector<8x64xf32>
    %c1_55 = arith.constant 1 : index
    %c0_56 = arith.constant 0 : index
    %c0_57 = arith.constant 0 : index
    %c0_58 = arith.constant 0 : index
    %c8_59 = arith.constant 8 : index
    %43 = vector.load %arg1[%c1_55, %c0_56, %c0_57, %c0_58, %c8_59] : memref<3x2x1x4x72xf32, #tpu.memory_space<vmem>>, vector<1x1x1x4x64xf32>
    %44 = vector.shape_cast %43 : vector<1x1x1x4x64xf32> to vector<4x64xf32>
    %c7 = arith.constant 7 : index
    %c0_60 = arith.constant 0 : index
    %c0_61 = arith.constant 0 : index
    %45 = vector.load %arg2[%c7, %c0_60, %c0_61] : memref<9x8x4xf32, #tpu.memory_space<vmem>>, vector<1x8x4xf32>
    %46 = vector.shape_cast %45 : vector<1x8x4xf32> to vector<8x4xf32>
    %cst_62 = arith.constant dense<0.000000e+00> : vector<8x64xf32>
    %47 = tpu.matmul %46, %44, %cst_62 {dimension_numbers = #tpu.dot_dimension_numbers<[1], [0], [0], [1], [0, 0, 1, 1], [], []>} : vector<8x4xf32>, vector<4x64xf32>, vector<8x64xf32> -> vector<8x64xf32>
    %48 = arith.addf %42, %47 : vector<8x64xf32>
    %c2_63 = arith.constant 2 : index
    %c0_64 = arith.constant 0 : index
    %c0_65 = arith.constant 0 : index
    %c0_66 = arith.constant 0 : index
    %c8_67 = arith.constant 8 : index
    %49 = vector.load %arg1[%c2_63, %c0_64, %c0_65, %c0_66, %c8_67] : memref<3x2x1x4x72xf32, #tpu.memory_space<vmem>>, vector<1x1x1x4x64xf32>
    %50 = vector.shape_cast %49 : vector<1x1x1x4x64xf32> to vector<4x64xf32>
    %c8_68 = arith.constant 8 : index
    %c0_69 = arith.constant 0 : index
    %c0_70 = arith.constant 0 : index
    %51 = vector.load %arg2[%c8_68, %c0_69, %c0_70] : memref<9x8x4xf32, #tpu.memory_space<vmem>>, vector<1x8x4xf32>
    %52 = vector.shape_cast %51 : vector<1x8x4xf32> to vector<8x4xf32>
    %cst_71 = arith.constant dense<0.000000e+00> : vector<8x64xf32>
    %53 = tpu.matmul %52, %50, %cst_71 {dimension_numbers = #tpu.dot_dimension_numbers<[1], [0], [0], [1], [0, 0, 1, 1], [], []>} : vector<8x4xf32>, vector<4x64xf32>, vector<8x64xf32> -> vector<8x64xf32>
    %54 = arith.addf %48, %53 : vector<8x64xf32>
    %c0_72 = arith.constant 0 : index
    %c0_73 = arith.constant 0 : index
    %55 = vector.load %arg3[%c0_72, %c0_73] : memref<8x1xf32, #tpu.memory_space<vmem>>, vector<8x1xf32>
    %56 = vector.broadcast %55 : vector<8x1xf32> to vector<8x64xf32>
    %57 = arith.addf %54, %56 : vector<8x64xf32>
    %c0_74 = arith.constant 0 : index
    %c0_75 = arith.constant 0 : index
    %c0_76 = arith.constant 0 : index
    %58 = vector.load %arg4[%c0_74, %c0_75, %c0_76] : memref<1x8x64xf32, #tpu.memory_space<vmem>>, vector<1x8x64xf32>
    %59 = vector.shape_cast %58 : vector<1x8x64xf32> to vector<8x64xf32>
    %60 = vector.shape_cast %57 : vector<8x64xf32> to vector<1x8x64xf32>
    tpu.vector_store %arg4[%c0_74, %c0_75, %c0_76], %60 {strides = array<i32>} : memref<1x8x64xf32, #tpu.memory_space<vmem>>, vector<1x8x64xf32>,
    return
  }
  func.func @transform_0(%arg0: i32) -> (i32, i32, i32, i32, i32) {
    %c0_i32 = arith.constant 0 : i32
    %c0_i32_0 = arith.constant 0 : i32
    %c0_i32_1 = arith.constant 0 : i32
    %c0_i32_2 = arith.constant 0 : i32
    %c0_i32_3 = arith.constant 0 : i32
    return %c0_i32, %c0_i32_0, %arg0, %c0_i32_1, %c0_i32_2 : i32, i32, i32, i32, i32
  }
  func.func @transform_1(%arg0: i32) -> (i32, i32, i32) {
    %c0_i32 = arith.constant 0 : i32
    %c0_i32_0 = arith.constant 0 : i32
    %c0_i32_1 = arith.constant 0 : i32
    %c0_i32_2 = arith.constant 0 : i32
    return %c0_i32, %c0_i32_0, %c0_i32_1 : i32, i32, i32
  }
  func.func @transform_2(%arg0: i32) -> (i32, i32) {
    %c0_i32 = arith.constant 0 : i32
    %c0_i32_0 = arith.constant 0 : i32
    %c0_i32_1 = arith.constant 0 : i32
    return %c0_i32, %c0_i32_0 : i32, i32
  }
  func.func @transform_3(%arg0: i32) -> (i32, i32, i32) {
    %c0_i32 = arith.constant 0 : i32
    %c0_i32_0 = arith.constant 0 : i32
    %c0_i32_1 = arith.constant 0 : i32
    return %arg0, %c0_i32, %c0_i32_0 : i32, i32, i32
  }
}

</mosaic_0001>

<bundles_post_ra>
// kernel: downsample_forward.1
= control target key start
LH: loop header
LB: loop body
LE: loop exit
PB: predicated region body
PF: predicated region fallthrough
CT: control target
= control target key end

     0   :  { %s1205_s12 = smov 0   ;;  %s1207_s13 = smov 0   ;;  %s1316_s0 = inlined_call_operand.vmem [shape: f32[3,2,2,4,72], index: 0, kind: input, shape index: {}]   ;;  %s1317_s1 = inlined_call_operand.vmem [shape: f32[9,8,4], index: 1, kind: input, shape index: {}]   ;;  %s1318_s2 = inlined_call_operand.vmem [shape: f32[8,1], index: 2, kind: input, shape index: {}]   ;;  %s1319_s3 = inlined_call_operand.vmem [shape: f32[2,8,64], index: 3, kind: output, shape index: {}]  }
   0x1   :  { %s1209_s14 = smov 0  }
   0x2 LB: > { %s1022_s15 = sadd.s32 4294967295, %s1179_s14   ;;  %s1222_s16 = sadd.s32 1, %s1179_s14   ;;  %s1179_s14 = sphi %s1209_s14, %s1322_s14   ;;  %s1175_s13 = sphi %s1207_s13, %s1321_s13   ;;  %s1171_s12 = sphi %s1205_s12, %s1320_s12  }
   0x3   : > { %s17_s17 = ssub.s32 %s1179_s14, %s1222_s16  ;;  %s20_s18 = sadd.s32 1, %s1175_s13 }
   0x4   : > { %p18_p0 = scmp.eq.s32.totalorder %s17_s17, 0  ;;  %p27_p1 = scmp.ne.s32.totalorder %s1175_s13, %s1171_s12 }
   0x5   : > { %p28_p2 = scmp.eq.s32.totalorder %s1179_s14, 0  ;;  %p1025_p4 = scmp.ge.s32.totalorder %s1179_s14, 2 }
   0x6   : > { %s1231_s19 = scalar_select %p18_p0, %s1175_s13, %s20_s18  }
   0x7   : > { %p29_p3 = por %p28_p2, %p27_p1  ;;  %127 = sbr.rel (%p1025_p4) target bundleno = 22 (0x16), region = 24 }
   0xe   : > { %130 = sbr.rel (!%p29_p3) target bundleno = 22 (0x16), region = 28  ;;  %s132_s20 = sand.u32 (%p29_p3), 1, %s1175_s13  }
   0xf   : > { %s1026_s21 = sshll.u32 (%p29_p3), %s1179_s14, 2  ;;  %s1125_s22 = smul.u32 (%p29_p3), 24, %s132_s20 }
  0x10   : > { %s136_s25 = scalar_lea.vmem (%p29_p3), %s1316_s0, %s1026_s21 }
  0x11   : > { %v152_v0 = vld [vmem:[%s136_s25] sm:$0xf] (%p29_p3)  ;;  %v154_v1 = vld [vmem:[%s136_s25 + $0x8] sm:$0xf] (%p29_p3)  ;;  %v156_v2 = vld [vmem:[%s136_s25 + $0x10] sm:$0xf] (%p29_p3) }
  0x12   : > { %v158_v3 = vld [vmem:[%s136_s25 + $0x18] sm:$0xf] (%p29_p3)  ;;  %v160_v4 = vld [vmem:[%s136_s25 + $0x20] sm:$0xf] (%p29_p3)  ;;  %s134_s26 = scalar_lea.vmem (%p29_p3), [#allocation2], %s1125_s22 }
  0x13   : > { %153 = vst [vmem:[%s134_s26] sm:$0xf] (%p29_p3), %v152_v0  ;;  %155 = vst [vmem:[%s134_s26 + $0x4] sm:$0xf] (%p29_p3), %v154_v1  ;;  %v162_v5 = vld [vmem:[%s136_s25 + $0x28] sm:$0xf] (%p29_p3) }
  0x14   : > { %157 = vst [vmem:[%s134_s26 + $0x8] sm:$0xf] (%p29_p3), %v156_v2  ;;  %159 = vst [vmem:[%s134_s26 + $0xc] sm:$0xf] (%p29_p3), %v158_v3 }
  0x15   : > { %161 = vst [vmem:[%s134_s26 + $0x10] sm:$0xf] %v160_v4  ;;  %163 = vst [vmem:[%s134_s26 + $0x14] sm:$0xf] %v162_v5 }
  0x16 PF: > { %p1027_p5 = scmp.ge.s32.totalorder %s1179_s14, 1  ;;  %p197_p6 = scmp.lt.s32.totalorder %s1179_s14, 3 }
  0x18   : > { %p198_p7 = pnand %p1027_p5, %p197_p6 }
  0x19   : > { %s204_s27 = sand.u32 (!%p198_p7), 1, %s1171_s12   ;;  %v1181_v6 = vmov (!%p198_p7), 0.0   ;;  %vm1182_vm0 = vmmov (!%p198_p7), 0   ;;  %vm240_vm1 = vcmask (!%p198_p7), 1043456   ;;  %v1183_v7 = vmov (!%p198_p7), 0   ;;  %v1030_v10 = vld [vmem:[%s1317_s1 + $0x8] sm:$0xff] (!%p198_p7) }
  0x1a   : > { %201 = sbr.rel (%p198_p7) target bundleno = 370 (0x172), region = 69  ;;  %1080 = vmatprep.subr.mxu0 (!%p198_p7), %v1181_v6  ;;  %1082 = vmatprep.mubr.msk.f32.mxu0 (!%p198_p7), %vm1182_vm0, %v1181_v6  ;;  %vm236_vm2 = vcmask (!%p198_p7), 31744   ;;  %s1184_s5 = smov (!%p198_p7), 120   ;;  %v231_v12 = vld [vmem:[%s1317_s1] sm:$0xff] (!%p198_p7)  ;;  %v1036_v13 = vld [vmem:[%s1317_s1 + $0x10] sm:$0xff] (!%p198_p7)  ;;  %v1040_v15 = vld [vmem:[%s1317_s1 + $0x18] sm:$0xff] (!%p198_p7) }
  0x1b   : > { %s1126_s28 = smul.u32 (!%p198_p7), 24, %s204_s27  ;;  %1085 = vmatprep.subr.mxu1 (!%p198_p7), %v1181_v6  ;;  %1087 = vmatprep.mubr.msk.f32.mxu1 (!%p198_p7), %vm1182_vm0, %v1181_v6  ;;  %v1044_v17 = vld [vmem:[%s1317_s1 + $0x20] sm:$0xff] (!%p198_p7)  ;;  %v1048_v19 = vld [vmem:[%s1317_s1 + $0x28] sm:$0xff] (!%p198_p7)  ;;  %v1051_v21 = vld [vmem:[%s1317_s1 + $0x30] sm:$0xff] (!%p198_p7)  ;;  %p226_p8 = scmp.lt.s32.totalorder (!%p198_p7), %s1022_s15, 1  ;;  %vm961_vm3 = vcmask (!%p198_p7), 523264  }
  0x1c   : > { %1155 = vset.pattern.permute.xlu1 (!%p198_p7), %v1183_v7  ;;  %1156 = vset.pattern.permute.xlu0 (!%p198_p7), %v1183_v7  ;;  %v954_v20 = vld [vmem:[%s1318_s2] sm:$0xff] (!%p198_p7)  ;;  %v1054_v24 = vld [vmem:[%s1317_s1 + $0x38] sm:$0xff] (!%p198_p7) }
  0x1d   : > { %s206_s29 = scalar_lea.vmem (!%p198_p7), [#allocation2], %s1126_s28  ;;  %v1057_v25 = vld [vmem:[%s1317_s1 + $0x40] sm:$0xff] (!%p198_p7) }
  0x1e   : > { %v230_v8 = vld [vmem:[%s206_s29] sm:$0xf] (!%p198_p7)  ;;  %v1035_v9 = vld [vmem:[%s206_s29 + $0x10] sm:$0xf] (!%p198_p7)  ;;  %v1029_v11 = vld [vmem:[%s206_s29 + $0x8] sm:$0xf] (!%p198_p7) }
  0x1f   : > { %716 = vrot.lane.b32.xlu0 (!%p198_p7), %v230_v8, %s1184_s5  ;;  %876 = vrot.lane.b32.xlu1 (!%p198_p7), %v1035_v9, %s1184_s5  ;;  %v1039_v14 = vld [vmem:[%s206_s29 + $0x4] sm:$0xf] (!%p198_p7)  ;;  %v1043_v16 = vld [vmem:[%s206_s29 + $0xc] sm:$0xf] (!%p198_p7) }
  0x20   : > { %1081 = vmatpush3.msk.msra.mxu0 (!%p198_p7), %vm240_vm1, %v1029_v11  ;;  %1086 = vmatpush3.msk.msra.mxu1 (!%p198_p7), %vm240_vm1, %v230_v8  ;;  %v1047_v18 = vld [vmem:[%s206_s29 + $0x14] sm:$0xf] (!%p198_p7) }
  0x21   : > { %1083 = vmatmul.mubr.msk.f32.vlgmr.msra.gmra.mrb[0].mxu0 %vm236_vm2, %v1030_v10  ;;  %1090 = vmatprep.subr.mxu0 %v1181_v6  ;;  %s1324_s15 = smov (!%p226_p8, %s1022_s15), 1 }
  0x22   : > { %1088 = vmatmul.mubr.msk.f32.vlgmr.msra.gmra.mrb[0].mxu1 %vm236_vm2, %v231_v12  ;;  %1091 = vmatpush3.msk.msra.mxu0 %vm240_vm1, %v1035_v9  ;;  %s1028_s29 = sshll.u32 %s1324_s15, 3 }
  0x23   : > { %796 = vrot.lane.b32.xlu0 %v1029_v11, %s1184_s5  ;;  %1092 = vmatprep.mubr.msk.f32.mxu0 %vm1182_vm0, %v1181_v6  ;;  %s229_s5 = scalar_lea.vmem %s1319_s3, %s1028_s29 }
  0x24   : > { %1095 = vmatprep.subr.mxu1 %v1181_v6  ;;  %1097 = vmatprep.mubr.msk.f32.mxu1 %vm1182_vm0, %v1181_v6 }
  0x25   : > { %1093 = vmatmul.mubr.msk.f32.vlgmr.msra.gmra.mrb[2].mxu0 %vm236_vm2, %v1036_v13  ;;  %1096 = vmatpush3.msk.msra.mxu1 %vm240_vm1, %v1039_v14 }
  0x26   : > { %1100 = vmatprep.subr.mxu0 %v1181_v6  ;;  %1098 = vmatmul.mubr.msk.f32.vlgmr.msra.gmra.mrb[2].mxu1 %vm236_vm2, %v1040_v15 }
  0x27   : > { %1101 = vmatpush3.msk.msra.mxu0 %vm240_vm1, %v1043_v16  ;;  %1102 = vmatprep.mubr.msk.f32.mxu0 %vm1182_vm0, %v1181_v6 }
  0x28   : > { %1110 = vmatprep.subr.mxu0 %v1181_v6  ;;  %1105 = vmatprep.subr.mxu1 %v1181_v6 }
  0x29   : > { %1103 = vmatmul.mubr.msk.f32.vlgmr.msra.gmra.mrb[4].mxu0 %vm236_vm2, %v1044_v17  ;;  %1106 = vmatpush3.msk.msra.mxu1 %vm240_vm1, %v1047_v18 }
  0x2a   : > { %1107 = vmatprep.mubr.msk.f32.mxu1 %vm1182_vm0, %v1181_v6  ;;  %1112 = vmatprep.mubr.msk.f32.mxu0 %vm1182_vm0, %v1181_v6 }
  0x2b   : > { %1108 = vmatmul.mubr.msk.f32.vlgmr.msra.gmra.mrb[4].mxu1 %vm236_vm2, %v1048_v19  ;;  %1115 = vmatprep.subr.mxu1 %v1181_v6 }
  0x2c   : > { %1117 = vmatprep.mubr.msk.f32.mxu1 %vm1182_vm0, %v1181_v6  ;;  %957 = vperm.xlu1 %1155, %v954_v20  }
  0x91   : > { %v717_v22 = vpop.permute.xlu0 %716  ;;  %v877_v23 = vpop.permute.xlu1 %876 }
  0x92   : > { %1111 = vmatpush3.msk.msra.mxu0 %vm240_vm1, %v717_v22 }
  0x93   : > { %1113 = vmatmul.mubr.msk.f32.vlgmr.msra.gmra.mrb[6].mxu0 %vm236_vm2, %v1051_v21  ;;  %1120 = vmatprep.subr.mxu0 %v1181_v6 }
  0x94   : > { %1121 = vmatpush3.msk.msra.mxu0 %vm240_vm1, %v877_v23  ;;  %1122 = vmatprep.mubr.msk.f32.mxu0 %vm1182_vm0, %v1181_v6 }
  0x95   : > { %v797_v26 = vpop.permute.xlu0 %796 }
  0x96   : > { %1116 = vmatpush3.msk.msra.mxu1 %vm240_vm1, %v797_v26 }
  0x97   : > { %1118 = vmatmul.mubr.msk.f32.vlgmr.msra.gmra.mrb[6].mxu1 %vm236_vm2, %v1054_v24  ;;  %1123 = vmatmul.mubr.msk.f32.vlgmr.msra.gmra.mrb[8].mxu0 %vm236_vm2, %v1057_v25 }
  0xab   : > { %v958_v52 = vpop.permute.xlu1 %957 }
  0xf4   : > { %v310_v27 = vpop.f32.mrb[0].mxu0 }
  0xf5   : > { %v1084_v28 = vpop.f32.mrb[1].mxu0  ;;  %v386_v29 = vpop.f32.mrb[0].mxu1 }
  0xf6   : > { %v387_v30 = vadd.f32 %v386_v29, %v310_v27  ;;  %v1089_v31 = vpop.f32.mrb[1].mxu1 }
  0xf8   : > { %v466_v32 = vpop.f32.mrb[2].mxu0 }
  0xf9   : > { %v470_v33 = vadd.f32 %v466_v32, %v387_v30  ;;  %v1094_v34 = vpop.f32.mrb[3].mxu0  ;;  %v547_v35 = vpop.f32.mrb[2].mxu1 }
  0xfa   : > { %v1099_v36 = vpop.f32.mrb[3].mxu1 }
  0xfb   : > { %v551_v37 = vadd.f32 %v547_v35, %v470_v33 }
  0xfc   : > { %v628_v38 = vpop.f32.mrb[4].mxu0 }
  0xfd   : > { %v632_v39 = vadd.f32 %v628_v38, %v551_v37  ;;  %v1104_v40 = vpop.f32.mrb[5].mxu0 }
  0xfe   : > { %v709_v41 = vpop.f32.mrb[4].mxu1 }
  0xff   : > { %v713_v42 = vadd.f32 %v709_v41, %v632_v39  ;;  %v1109_v43 = vpop.f32.mrb[5].mxu1 }
 0x166   : > { %v789_v44 = vpop.f32.mrb[6].mxu0 }
 0x167   : > { %v793_v45 = vadd.f32 %v789_v44, %v713_v42  ;;  %v1114_v46 = vpop.f32.mrb[7].mxu0 }
 0x16a   : > { %v869_v47 = vpop.f32.mrb[6].mxu1  ;;  %v949_v48 = vpop.f32.mrb[8].mxu0 }
 0x16b   : > { %v873_v49 = vadd.f32 %v869_v47, %v793_v45  ;;  %v1119_v50 = vpop.f32.mrb[7].mxu1  ;;  %v1124_v51 = vpop.f32.mrb[9].mxu0 }
 0x16d   : > { %v953_v53 = vadd.f32 %v949_v48, %v873_v49 }
 0x16f   : > { %v960_v54 = vadd.f32 %v958_v52, %v953_v53 }
 0x171   : > { %962 = vst.msk [vmem:[%s229_s5] sm:$0xff] %vm961_vm3, %v960_v54 }
 0x172 PF: > { %p10_p9 = scmp.ge.s32.totalorder %s1222_s16, 4   ;;  %s1320_s12 = smov %s1175_s13 }
 0x173   : > { %s1321_s13 = smov %s1231_s19  ;;  %s1322_s14 = smov %s1222_s16 }
 0x174   :  { %12 = sbr.rel (!%p10_p9) target bundleno = 2 (0x2), region = 121 }

</bundles_post_ra>
